<compile_context>
chip_gen: v7x
topology: tpu7x:2x2x1
jax: 0.10.0
libtpu: 0.0.40
codegen_flags: <defaults>
</compile_context>

<pallas_src>
import functools
import math

import jax
import jax.numpy as jnp
import numpy as np
from jax.experimental import pallas as pl
from jax.experimental.pallas import tpu as pltpu

LN_EPS = 1e-12


def _fused_add_ln_kernel(tok_ref, onehot_ref, pos_ref, tt_table_ref,
                         gamma_ref, beta_ref, out_ref, *, hidden):
    # tok_ref    : (rows, Hp)  spliced CLS|imgs|SEP embeddings (flattened rows)
    # onehot_ref : (rows, V)   token-type one-hot (V tiny)
    # pos_ref    : (rows, Hp)  position embeddings, resident across the grid
    # tt_table_ref: (V, Hp)    token-type embedding table, resident
    # gamma/beta : (1, Hp)     LayerNorm affine params, resident
    # out_ref    : (rows, Hp)
    x = tok_ref[...].astype(jnp.float32) + pos_ref[...].astype(jnp.float32)

    oh = onehot_ref[...].astype(jnp.float32)          # (rows, V)
    table = tt_table_ref[...].astype(jnp.float32)     # (V, Hp)
    for v in range(table.shape[0]):                   # V is tiny & static
        x = x + oh[:, v:v + 1] * table[v:v + 1, :]

    # One-pass LayerNorm stats over the true hidden width.
    # Padded lanes (if Hp > H) are zero everywhere, so sums are exact.
    inv_h = jnp.float32(1.0 / hidden)
    mean = jnp.sum(x, axis=-1, keepdims=True) * inv_h
    mean_sq = jnp.sum(x * x, axis=-1, keepdims=True) * inv_h
    var = jnp.maximum(mean_sq - mean * mean, 0.0)
    y = (x - mean) * jax.lax.rsqrt(var + LN_EPS)
    y = y * gamma_ref[...].astype(jnp.float32) + beta_ref[...].astype(jnp.float32)

    out_ref[...] = y.astype(out_ref.dtype)
    # TODO(synk): dropout (p=args.dropout) omitted — inference/identity; a
    # training kernel would mask with pltpu.prng_seed / pltpu.prng_random_bits.


def _round_up(x, m):
    return ((x + m - 1) // m) * m


def _choose_tiling(batch, seq, hidden_padded, itemsize):
    """Pick batch-rows-per-step so double-buffered tiles fit VMEM on any gen."""
    # Sublane alignment for partial blocks: second-to-last block dim must be a
    # multiple of the native sublane tile (8 for 32-bit, 16 for bf16).
    sublane = 8 * max(1, 4 // max(1, itemsize))
    m = sublane // math.gcd(seq, sublane)   # bt granularity so bt*seq % sublane == 0

    try:
        vmem_cap = pltpu.get_tpu_info().vmem_capacity_bytes  # 64 MiB v7x, 128 MiB v5e/v6e
    except Exception:
        vmem_cap = 64 * 1024 * 1024                          # conservative fallback
    budget = vmem_cap // 2                                    # headroom for pipelining
    # Approx f32-equivalent bytes per flattened row held in VMEM:
    #   2 x (tok in + out) double-buffered + resident pos, plus the tiny one-hot.
    per_row = 5 * hidden_padded * 4 + 4 * 128 * 4
    bt_cap = max(1, (budget // per_row) // seq)

    bt = min(bt_cap, batch)
    bt = max(m, (bt // m) * m)
    padded_batch = _round_up(batch, bt)
    steps = padded_batch // bt
    # v7x megacore: prefer >=2 parallel grid steps when the batch allows it.
    if steps == 1 and bt >= 2 * m and batch > m:
        bt = max(m, ((bt // 2) // m) * m)
        padded_batch = _round_up(batch, bt)
        steps = padded_batch // bt

    vmem_limit = int(vmem_cap * 3 // 4)   # ~48 MiB on v7x, ~96 MiB on v5e/v6e
    return bt, padded_batch, steps, vmem_limit


def image_bert_embeddings(input_imgs, token_type_ids, params):
    """input_imgs: (B, N, H); token_type_ids: (B, N+2) int32."""
    B, N, H = input_imgs.shape
    S = N + 2
    dtype = input_imgs.dtype
    assert token_type_ids.shape == (B, S)
    assert S <= params["position_embeddings"].shape[0], "seq exceeds max positions"

    word_emb = params["word_embeddings"]
    cls_vec = word_emb[params["cls_id"]].astype(dtype)   # (H,)
    sep_vec = word_emb[params["sep_id"]].astype(dtype)   # (H,)

    # CLS | imgs | SEP splice stays in XLA (fuses with the broadcasts).
    tok = jnp.concatenate(
        [jnp.broadcast_to(cls_vec[None, None, :], (B, 1, H)),
         input_imgs,
         jnp.broadcast_to(sep_vec[None, None, :], (B, 1, H))], axis=1)  # (B,S,H)

    pos = params["position_embeddings"][:S].astype(jnp.float32)         # (S,H)
    tt_table = params["token_type_embeddings"].astype(jnp.float32)      # (V,H)
    gamma = params["ln_gamma"].astype(jnp.float32)                      # (H,)
    beta = params["ln_beta"].astype(jnp.float32)                        # (H,)
    V = tt_table.shape[0]

    Hp = _round_up(H, 128)   # lane-dense hidden (no-op when H % 128 == 0)
    bt, Bp, steps, vmem_limit = _choose_tiling(B, S, Hp, jnp.dtype(dtype).itemsize)
    rows = bt * S
    total = Bp * S

    if Bp != B:  # pad batch so the flat array divides evenly into row tiles
        tok = jnp.pad(tok, ((0, Bp - B), (0, 0), (0, 0)))
        token_type_ids = jnp.pad(token_type_ids, ((0, Bp - B), (0, 0)))

    tok_flat = tok.reshape(total, H)
    ids_flat = token_type_ids.reshape(total)
    # Tiny (rows, V) one-hot instead of a materialized (B, S, H) gather.
    onehot = (ids_flat[:, None] ==
              jnp.arange(V, dtype=ids_flat.dtype)[None, :]).astype(dtype)

    if Hp != H:
        tok_flat = jnp.pad(tok_flat, ((0, 0), (0, Hp - H)))
        pos = jnp.pad(pos, ((0, 0), (0, Hp - H)))
        tt_table = jnp.pad(tt_table, ((0, 0), (0, Hp - H)))
        gamma = jnp.pad(gamma, (0, Hp - H))
        beta = jnp.pad(beta, (0, Hp - H))

    pos_tiled = jnp.tile(pos, (bt, 1))      # (rows, Hp), resident across grid
    gamma2 = gamma[None, :]                 # (1, Hp)
    beta2 = beta[None, :]                   # (1, Hp)

    kernel = functools.partial(_fused_add_ln_kernel, hidden=float(H))

    out = pl.pallas_call(
        kernel,
        out_shape=jax.ShapeDtypeStruct((total, Hp), dtype),
        grid=(steps,),
        in_specs=[
            pl.BlockSpec((rows, Hp), lambda i: (i, 0)),   # spliced token embeds
            pl.BlockSpec((rows, V), lambda i: (i, 0)),    # token-type one-hot
            pl.BlockSpec((rows, Hp), lambda i: (0, 0)),   # position embeds (resident)
            pl.BlockSpec((V, Hp), lambda i: (0, 0)),      # token-type table (resident)
            pl.BlockSpec((1, Hp), lambda i: (0, 0)),      # LN gamma
            pl.BlockSpec((1, Hp), lambda i: (0, 0)),      # LN beta
        ],
        out_specs=pl.BlockSpec((rows, Hp), lambda i: (i, 0)),
        compiler_params=pltpu.CompilerParams(
            dimension_semantics=("parallel",),
            vmem_limit_bytes=vmem_limit),
    )(tok_flat, onehot, pos_tiled, tt_table, gamma2, beta2)

    out = out.reshape(Bp, S, Hp)
    return out[:B, :, :H]


def _reference(input_imgs, token_type_ids, params):
    B, N, H = input_imgs.shape
    S = N + 2
    word_emb = params["word_embeddings"]
    cls = jnp.broadcast_to(word_emb[params["cls_id"]][None, None, :], (B, 1, H))
    sep = jnp.broadcast_to(word_emb[params["sep_id"]][None, None, :], (B, 1, H))
    tok = jnp.concatenate([cls, input_imgs, sep], axis=1)
    pos = params["position_embeddings"][:S][None, :, :]
    tt = jnp.take(params["token_type_embeddings"], token_type_ids, axis=0)
    x = tok + pos + tt
    mean = jnp.mean(x, axis=-1, keepdims=True)
    var = jnp.mean(jnp.square(x - mean), axis=-1, keepdims=True)
    y = (x - mean) / jnp.sqrt(var + LN_EPS)
    return y * params["ln_gamma"] + params["ln_beta"]


if __name__ == "__main__":
    # Small shapes consistent with the module:
    # batch=2, num_image_embeds=6 -> seq=8, hidden=32
    B, N, H = 2, 6, 32
    S = N + 2
    VOCAB, MAX_POS, TYPE_VOCAB = 50, 64, 2
    CLS_ID, SEP_ID = 1, 2

    key = jax.random.PRNGKey(0)
    k_img, k_tt, k_w, k_p, k_t, k_g, k_b = jax.random.split(key, 7)

    input_imgs = jax.random.normal(k_img, (B, N, H), dtype=jnp.float32)
    token_type_ids = jax.random.randint(k_tt, (B, S), 0, TYPE_VOCAB).astype(jnp.int32)

    params = {
        "word_embeddings": jax.random.normal(k_w, (VOCAB, H), jnp.float32) * 0.02,
        "position_embeddings": jax.random.normal(k_p, (MAX_POS, H), jnp.float32) * 0.02,
        "token_type_embeddings": jax.random.normal(k_t, (TYPE_VOCAB, H), jnp.float32) * 0.02,
        "ln_gamma": 1.0 + 0.01 * jax.random.normal(k_g, (H,), jnp.float32),
        "ln_beta": 0.01 * jax.random.normal(k_b, (H,), jnp.float32),
        "cls_id": CLS_ID,
        "sep_id": SEP_ID,
    }

    # f32 I/O path (tight check against the two-pass reference).
    out = image_bert_embeddings(input_imgs, token_type_ids, params)
    out = jax.block_until_ready(out)
    ref = _reference(input_imgs, token_type_ids, params)
    np.testing.assert_allclose(np.asarray(out), np.asarray(ref),
                               rtol=1e-5, atol=1e-5)
    assert out.shape == (B, S, H)

    # bf16 I/O path (halves HBM bytes on this bandwidth-bound kernel; the
    # kernel still accumulates LayerNorm stats in f32).
    imgs_bf16 = input_imgs.astype(jnp.bfloat16)
    out_bf16 = jax.block_until_ready(
        image_bert_embeddings(imgs_bf16, token_type_ids, params))
    ref_bf16 = _reference(imgs_bf16.astype(jnp.float32), token_type_ids, params)
    assert out_bf16.dtype == jnp.bfloat16
    np.testing.assert_allclose(np.asarray(out_bf16, dtype=np.float32),
                               np.asarray(ref_bf16), rtol=2e-2, atol=2e-2)

    print("KERNEL_OK")
</pallas_src>

<mosaic_0001>
module attributes {stable_mosaic.version = 11 : i64} {
  func.func @_fused_add_ln_kernel(%arg0: i32, %arg1: memref<8x128xf32, #tpu.memory_space<vmem>>, %arg2: memref<8x2xf32, #tpu.memory_space<vmem>>, %arg3: memref<8x128xf32, #tpu.memory_space<vmem>>, %arg4: memref<2x128xf32, #tpu.memory_space<vmem>>, %arg5: memref<1x128xf32, #tpu.memory_space<vmem>>, %arg6: memref<1x128xf32, #tpu.memory_space<vmem>>, %arg7: memref<8x128xf32, #tpu.memory_space<vmem>>) attributes {dimension_semantics = [#tpu.dimension_semantics<parallel>], iteration_bounds = array<i64: 2>, scalar_prefetch = 0 : i64, scratch_operands = 0 : i64, tpu.core_type = #tpu.core_type<tc>, window_params = [{transform_indices = @transform_0, window_bounds = array<i64: 8, 128>}, {transform_indices = @transform_1, window_bounds = array<i64: 8, 2>}, {pipeline_mode = #tpu.pipeline_mode<synchronous>, transform_indices = @transform_2, window_bounds = array<i64: 8, 128>}, {pipeline_mode = #tpu.pipeline_mode<synchronous>, transform_indices = @transform_3, window_bounds = array<i64: 2, 128>}, {pipeline_mode = #tpu.pipeline_mode<synchronous>, transform_indices = @transform_4, window_bounds = array<i64: 1, 128>}, {pipeline_mode = #tpu.pipeline_mode<synchronous>, transform_indices = @transform_5, window_bounds = array<i64: 1, 128>}, {transform_indices = @transform_6, window_bounds = array<i64: 8, 128>}]} {
    %c0 = arith.constant 0 : index
    %c0_0 = arith.constant 0 : index
    %0 = vector.load %arg1[%c0, %c0_0] : memref<8x128xf32, #tpu.memory_space<vmem>>, vector<8x128xf32>
    %c0_1 = arith.constant 0 : index
    %c0_2 = arith.constant 0 : index
    %1 = vector.load %arg3[%c0_1, %c0_2] : memref<8x128xf32, #tpu.memory_space<vmem>>, vector<8x128xf32>
    %2 = arith.addf %0, %1 : vector<8x128xf32>
    %c0_3 = arith.constant 0 : index
    %c0_4 = arith.constant 0 : index
    %3 = vector.load %arg2[%c0_3, %c0_4] : memref<8x2xf32, #tpu.memory_space<vmem>>, vector<8x2xf32>
    %c0_5 = arith.constant 0 : index
    %c0_6 = arith.constant 0 : index
    %4 = vector.load %arg4[%c0_5, %c0_6] : memref<2x128xf32, #tpu.memory_space<vmem>>, vector<2x128xf32>
    %5 = vector.extract_strided_slice %3 {offsets = [0, 0], sizes = [8, 1], strides = [1, 1]} : vector<8x2xf32> to vector<8x1xf32>
    %6 = vector.extract_strided_slice %4 {offsets = [0, 0], sizes = [1, 128], strides = [1, 1]} : vector<2x128xf32> to vector<1x128xf32>
    %7 = vector.broadcast %5 : vector<8x1xf32> to vector<8x128xf32>
    %8 = vector.broadcast %6 : vector<1x128xf32> to vector<8x128xf32>
    %9 = arith.mulf %7, %8 : vector<8x128xf32>
    %10 = arith.addf %2, %9 : vector<8x128xf32>
    %11 = vector.extract_strided_slice %3 {offsets = [0, 1], sizes = [8, 1], strides = [1, 1]} : vector<8x2xf32> to vector<8x1xf32>
    %12 = vector.extract_strided_slice %4 {offsets = [1, 0], sizes = [1, 128], strides = [1, 1]} : vector<2x128xf32> to vector<1x128xf32>
    %13 = vector.broadcast %11 : vector<8x1xf32> to vector<8x128xf32>
    %14 = vector.broadcast %12 : vector<1x128xf32> to vector<8x128xf32>
    %15 = arith.mulf %13, %14 : vector<8x128xf32>
    %16 = arith.addf %10, %15 : vector<8x128xf32>
    %cst = arith.constant dense<0.000000e+00> : vector<8xf32>
    %17 = vector.multi_reduction <add>, %16, %cst [1] : vector<8x128xf32> to vector<8xf32>
    %18 = vector.shape_cast %17 : vector<8xf32> to vector<8x1xf32>
    %cst_7 = arith.constant 3.125000e-02 : f32
    %19 = vector.broadcast %cst_7 : f32 to vector<8x1xf32>
    %20 = arith.mulf %18, %19 : vector<8x1xf32>
    %21 = arith.mulf %16, %16 : vector<8x128xf32>
    %cst_8 = arith.constant dense<0.000000e+00> : vector<8xf32>
    %22 = vector.multi_reduction <add>, %21, %cst_8 [1] : vector<8x128xf32> to vector<8xf32>
    %23 = vector.shape_cast %22 : vector<8xf32> to vector<8x1xf32>
    %cst_9 = arith.constant 3.125000e-02 : f32
    %24 = vector.broadcast %cst_9 : f32 to vector<8x1xf32>
    %25 = arith.mulf %23, %24 : vector<8x1xf32>
    %26 = arith.mulf %20, %20 : vector<8x1xf32>
    %27 = arith.subf %25, %26 : vector<8x1xf32>
    %cst_10 = arith.constant 0.000000e+00 : f32
    %28 = vector.broadcast %cst_10 : f32 to vector<8x1xf32>
    %29 = arith.maximumf %27, %28 : vector<8x1xf32>
    %30 = vector.broadcast %20 : vector<8x1xf32> to vector<8x128xf32>
    %31 = arith.subf %16, %30 : vector<8x128xf32>
    %cst_11 = arith.constant 9.99999996E-13 : f32
    %32 = vector.broadcast %cst_11 : f32 to vector<8x1xf32>
    %33 = arith.addf %29, %32 : vector<8x1xf32>
    %34 = math.rsqrt %33 : vector<8x1xf32>
    %35 = vector.broadcast %34 : vector<8x1xf32> to vector<8x128xf32>
    %36 = arith.mulf %31, %35 : vector<8x128xf32>
    %c0_12 = arith.constant 0 : index
    %c0_13 = arith.constant 0 : index
    %37 = vector.load %arg5[%c0_12, %c0_13] : memref<1x128xf32, #tpu.memory_space<vmem>>, vector<1x128xf32>
    %38 = vector.broadcast %37 : vector<1x128xf32> to vector<8x128xf32>
    %39 = arith.mulf %36, %38 : vector<8x128xf32>
    %c0_14 = arith.constant 0 : index
    %c0_15 = arith.constant 0 : index
    %40 = vector.load %arg6[%c0_14, %c0_15] : memref<1x128xf32, #tpu.memory_space<vmem>>, vector<1x128xf32>
    %41 = vector.broadcast %40 : vector<1x128xf32> to vector<8x128xf32>
    %42 = arith.addf %39, %41 : vector<8x128xf32>
    %c0_16 = arith.constant 0 : index
    %c0_17 = arith.constant 0 : index
    %43 = vector.load %arg7[%c0_16, %c0_17] : memref<8x128xf32, #tpu.memory_space<vmem>>, vector<8x128xf32>
    tpu.vector_store %arg7[%c0_16, %c0_17], %42 {strides = array<i32>} : memref<8x128xf32, #tpu.memory_space<vmem>>, vector<8x128xf32>,
    return
  }
  func.func @transform_0(%arg0: i32) -> (i32, i32) {
    %c0_i32 = arith.constant 0 : i32
    %c0_i32_0 = arith.constant 0 : i32
    return %arg0, %c0_i32 : i32, i32
  }
  func.func @transform_1(%arg0: i32) -> (i32, i32) {
    %c0_i32 = arith.constant 0 : i32
    %c0_i32_0 = arith.constant 0 : i32
    return %arg0, %c0_i32 : i32, i32
  }
  func.func @transform_2(%arg0: i32) -> (i32, i32) {
    %c0_i32 = arith.constant 0 : i32
    %c0_i32_0 = arith.constant 0 : i32
    %c0_i32_1 = arith.constant 0 : i32
    return %c0_i32, %c0_i32_0 : i32, i32
  }
  func.func @transform_3(%arg0: i32) -> (i32, i32) {
    %c0_i32 = arith.constant 0 : i32
    %c0_i32_0 = arith.constant 0 : i32
    %c0_i32_1 = arith.constant 0 : i32
    return %c0_i32, %c0_i32_0 : i32, i32
  }
  func.func @transform_4(%arg0: i32) -> (i32, i32) {
    %c0_i32 = arith.constant 0 : i32
    %c0_i32_0 = arith.constant 0 : i32
    %c0_i32_1 = arith.constant 0 : i32
    return %c0_i32, %c0_i32_0 : i32, i32
  }
  func.func @transform_5(%arg0: i32) -> (i32, i32) {
    %c0_i32 = arith.constant 0 : i32
    %c0_i32_0 = arith.constant 0 : i32
    %c0_i32_1 = arith.constant 0 : i32
    return %c0_i32, %c0_i32_0 : i32, i32
  }
  func.func @transform_6(%arg0: i32) -> (i32, i32) {
    %c0_i32 = arith.constant 0 : i32
    %c0_i32_0 = arith.constant 0 : i32
    return %arg0, %c0_i32 : i32, i32
  }
}

</mosaic_0001>

<bundles_post_ra>
// kernel: tpu_custom_call.1
= control target key start
LH: loop header
LB: loop body
LE: loop exit
PB: predicated region body
PF: predicated region fallthrough
CT: control target
= control target key end

     0   :  { %11 = vsyncpa [#allocation3], 0  ;;  %s681_s0 = inlined_call_operand.vmem [shape: f32[16,128], index: 0, kind: input, shape index: {}]   ;;  %s682_s1 = inlined_call_operand.vmem [shape: f32[16,2], index: 1, kind: input, shape index: {}]   ;;  %s683_s2 = inlined_call_operand.vmem [shape: f32[8,128], index: 2, kind: input, shape index: {}]   ;;  %s684_s3 = inlined_call_operand.vmem [shape: f32[2,128], index: 3, kind: input, shape index: {}]   ;;  %s685_s4 = inlined_call_operand.vmem [shape: f32[1,128], index: 4, kind: input, shape index: {}]   ;;  %s686_s5 = inlined_call_operand.vmem [shape: f32[1,128], index: 5, kind: input, shape index: {}]   ;;  %s687_s6 = inlined_call_operand.hbm [shape: f32[16,128], index: 6, kind: output, shape index: {}]  }
   0x1   :  { %13 = vsyncpa [#allocation3 + $0x1], 0  ;;  %s566_s21 = smov 0   ;;  %s568_s22 = smov 0  }
   0x2   :  { %s570_s23 = smov 0   ;;  %s572_s24 = smov 0  }
   0x3 LB: > { %s587_s25 = sadd.s32 4294967295, %s526_s24   ;;  %s406_s26 = sadd.s32 4294967294, %s526_s24   ;;  %s526_s24 = sphi %s572_s24, %s693_s24   ;;  %s522_s23 = sphi %s570_s23, %s692_s23   ;;  %s518_s22 = sphi %s568_s22, %s691_s22   ;;  %s514_s21 = sphi %s566_s21, %s690_s21  }
   0x4   : > { %s591_s27 = sadd.s32 1, %s526_s24   ;;  %s162_s28 = sadd.s32 1, %s522_s23 }
   0x5   : > { %s159_s29 = ssub.s32 %s526_s24, %s591_s27  ;;  %p172_p0 = scmp.ne.s32.totalorder %s522_s23, %s518_s22 }
   0x6   : > { %p160_p1 = scmp.eq.s32.totalorder %s159_s29, 0  ;;  %p173_p2 = scmp.eq.s32.totalorder %s587_s25, 1 }
   0x7   : > { %p178_p3 = scmp.ne.s32.totalorder %s518_s22, %s514_s21  ;;  %p179_p4 = scmp.eq.s32.totalorder %s406_s26, 1 }
   0x8   : > { %s602_s30 = scalar_select %p160_p1, %s522_s23, %s162_s28  }
   0x9   : > { %p604_p5 = por %p173_p2, %p172_p0  ;;  %p608_p6 = por %p179_p4, %p178_p3 }
   0xa   : > { %p409_p7 = scmp.ge.s32.totalorder %s526_s24, 1  ;;  %p223_p8 = scmp.lt.s32.totalorder %s526_s24, 3 }
   0xc   : > { %p224_p9 = pnand %p409_p7, %p223_p8 }
   0xd   : > { %p256_p10 = scmp.lt.s32.totalorder (!%p224_p9), %s587_s25, 1  ;;  %v528_v0 = vmov (!%p224_p9), 0   ;;  %v529_v2 = vmov (!%p224_p9), 1   ;;  %v274_v3 = vlaneseq (!%p224_p9)  ;;  %v268_v6 = vld [vmem:[%s684_s3] sm:$0x3] (!%p224_p9)  ;;  %s253_s26 = sand.u32 (!%p224_p9), 1, %s518_s22  }
   0xe   : > { %227 = sbr.rel (%p224_p9) target bundleno = 348 (0x15c), region = 44  ;;  %460 = vset.pattern.permute.xlu0 (!%p224_p9), %v528_v0  ;;  %v265_v9 = vld [vmem:[%s683_s2] sm:$0xff] (!%p224_p9)  ;;  %s410_s28 = sshll.u32 (!%p224_p9), %s253_s26, 3 }
   0xf   : > { %v275_v4 = vshrl.u32 (!%p224_p9), %v274_v3, 7  ;;  %v413_v30 = vld [vmem:[%s685_s4] ss:$0 sm:$0xff] (!%p224_p9)  ;;  %s416_s12 = sshll.u32 (!%p224_p9), %s587_s25, 7 }
  0x10   : > { %v414_v32 = vld [vmem:[%s686_s5] ss:$0 sm:$0xff] (!%p224_p9)  ;;  %s639_s17 = scalar_lea.hbm (!%p224_p9), %s687_s6, %s416_s12 }
  0x11   : > { %v276_v5 = vsub.s32 (!%p224_p9), 0, %v275_v4  ;;  %v286_v8 = vsub.s32 (!%p224_p9), 1, %v275_v4 }
  0x13   : > { %v277_v7 = vrot.slane (!%p224_p9), %v268_v6, %v276_v5  ;;  %v287_v14 = vrot.slane (!%p224_p9), %v268_v6, %v286_v8 }
  0x15   : > { %s257_s9 = scalar_select %p256_p10, %s587_s25, 1 }
  0x16   : > { %s530_s25 = smov [#allocation2]  }
  0x17   : > { %s411_s10 = sshll.u32 %s257_s9, 3  ;;  %s468_s20 = sshll.u32 %s530_s25, 4  ;;  %s469_s20 = int_to_ptr.vmem [resolvable:$false] %s468_s20 }
  0x18   : > { %s263_s13 = scalar_lea.vmem %s682_s1, %s411_s10  ;;  %s259_s18 = scalar_lea.vmem %s681_s0, %s411_s10 }
  0x19   : > { %v267_v1 = vld [vmem:[%s263_s13] sm:$0xff]  ;;  %s255_s13 = scalar_lea.vmem [#allocation2], %s410_s28  ;;  %s470_s28 = scalar_lea.vmem %s469_s20, 256 }
  0x1a   : > { %271 = vperm.xlu0 %460, %v267_v1   ;;  %v264_v10 = vld [vmem:[%s259_s18] sm:$0xff]  ;;  %s335_s14 = sshll.u32 %s255_s13, 4  ;;  %s322_s18 = scalar_lea.sflag [#allocation3], %s253_s26  ;;  %s641_s14 = int_to_ptr.vmem [resolvable:$true] %s335_s14 }
  0x1b   : > { %v266_v12 = vadd.f32 %v265_v9, %v264_v10  ;;  %s464_s19 = scalar_lea.vmem %s641_s14, 128  ;;  %p471_p0 = scmp.lt.s32.totalorder %s641_s14, %s469_s20 }
  0x1c   : > { %p465_p11 = scmp.ne.s32.totalorder %s641_s14, %s464_s19  ;;  %p472_p1 = scmp.lt.s32.totalorder %s470_s28, %s464_s19 }
  0x1e   : > { %461 = vset.pattern.permute.xlu0 %v529_v2  ;;  %p466_p12 = pnand %p465_p11, %p604_p5  ;;  %p473_p2 = por %p472_p1, %p471_p0 }
  0x1f   : > { %281 = vperm.xlu0 %461, %v267_v1  }
  0x20   : > { %p467_p13 = pneg %p466_p12 }
  0x22   : > { %p474_p3 = pnand %p473_p2, %p467_p13 }
  0x99   : > { %v272_v11 = vpop.permute.xlu0 %271 }
  0x9a   : > { %v278_v13 = vmul.f32 %v277_v7, %v272_v11 }
  0x9c   : > { %v279_v16 = vadd.f32 %v278_v13, %v266_v12 }
  0x9e   : > { %v282_v15 = vpop.permute.xlu0 %281 }
  0x9f   : > { %v288_v17 = vmul.f32 %v287_v14, %v282_v15 }
  0xa1   : > { %v289_v18 = vadd.f32 %v288_v17, %v279_v16 }
  0xa3   : > { %290 = vadd.xlane.f32.xlu1 %v289_v18  ;;  %v293_v19 = vmul.f32 %v289_v18, %v289_v18 }
  0xa7   : > { %294 = vadd.xlane.f32.xlu1 %v293_v19 }
 0x130   : > { %v291_v20 = vpop.xlane.xlu1 %290 }
 0x131   : > { %v292_v21 = vmul.f32 0.03125, %v291_v20 }
 0x133   : > { %v297_v23 = vmul.f32 %v292_v21, %v292_v21  ;;  %v300_v28 = vsub.f32 %v289_v18, %v292_v21 }
 0x134   : > { %v295_v22 = vpop.xlane.xlu1 %294 }
 0x135   : > { %v296_v24 = vmul.f32 0.03125, %v295_v22 }
 0x137   : > { %v298_v25 = vsub.f32 %v296_v24, %v297_v23 }
 0x139   : > { %v299_v26 = vmax.f32 %v298_v25, 0.0 }
 0x13b   : > { %v301_v27 = vadd.f32 1e-12, %v299_v26 }
 0x13d   : > { %462 = vrsqrt.f32 %v301_v27 }
 0x147   : > { %v463_v29 = vpop.eup %462 }
 0x148   : > { %v303_v31 = vmul.f32 %v463_v29, %v300_v28 }
 0x14a   : > { %v311_v33 = vmul.f32 %v413_v30, %v303_v31 }
 0x14c   : > { %v319_v34 = vadd.f32 %v414_v32, %v311_v33 }
 0x14e   : > { %320 = vst [vmem:[%s255_s13] sm:$0xff] %v319_v34 }
 0x14f   : > { %477 = shalt.err (!%p474_p3)
}
 0x150   : > { %s478_s26 = scalar_lea.hbm %s639_s17, 128  ;;  %s482_s10 = scalar_lea.hbm %s687_s6, 256 }
 0x151   : > { %p479_p4 = scmp.ne.s32.totalorder %s639_s17, %s478_s26  ;;  %p483_p9 = scmp.lt.u32.totalorder %s639_s17, %s687_s6 }
 0x152   : > { %p484_p10 = scmp.lt.u32.totalorder %s482_s10, %s478_s26  ;;  %p486_p12 = scmp.lt.u32.totalorder %s478_s26, %s639_s17 }
 0x153   : > { %p480_p7 = pnand %p479_p4, %p604_p5 }
 0x154   : > { %p485_p11 = por %p484_p10, %p483_p9 }
 0x155   : > { %p481_p8 = pneg %p480_p7 }
 0x156   : > { %p487_p13 = por %p486_p12, %p485_p11 }
 0x158   : > { %p488_p0 = pnand %p487_p13, %p481_p8 }
 0x15a   : > { %491 = shalt.err (!%p488_p0)
}
 0x15b   : > { %419 = dma.vmem_to_hbm [thread:$0]  (%p604_p5), %s641_s14, 128, %s639_s17, %s322_s18  }
 0x15c PF: > { %p425_p1 = scmp.ge.s32.totalorder %s526_s24, 2  ;;  %s347_s13 = sand.u32 1, %s514_s21  }
 0x15d   : > { %s348_s15 = scalar_lea.sflag [#allocation3], %s347_s13 }
 0x15e   : > { %p422_p2 = pnand %p425_p1, %p608_p6 }
 0x160   : > { %509 = dma.done.wait (!%p422_p2), %s348_s15, 128  }
 0x161   : > { %511 = vsyncadd (!%p422_p2), %s348_s15, 4294967168  ;;  %p16_p3 = scmp.ge.s32.totalorder %s591_s27, 4   ;;  %s690_s21 = smov %s518_s22 }
 0x162   : > { %s691_s22 = smov %s522_s23  ;;  %s692_s23 = smov %s602_s30 }
 0x163   : > { %s693_s24 = smov %s591_s27  ;;  %18 = sbr.rel (!%p16_p3) target bundleno = 3 (0x3), region = 82 }
 0x16a   :  { %353 = vsyncpa [#allocation3], 1 }
 0x16b   :  { %355 = vsyncpa [#allocation3 + $0x1], 1 }

</bundles_post_ra>
